<compile_context>
chip_gen: v7x
topology: tpu7x:2x2x1
jax: 0.10.0
libtpu: 0.0.40
codegen_flags: <defaults>
</compile_context>

<pallas_src>
import functools

import jax
import jax.numpy as jnp
from jax.experimental import pallas as pl
from jax.experimental.pallas import tpu as pltpu


def _round_up(x, m):
    return (x + m - 1) // m * m


def _choose_row_tile(n, tn_req):
    """Row tile (multiple of 8) + padded row count; keep >=2 row tiles when
    possible so both v7x TensorCores get work."""
    tn = _round_up(min(tn_req, _round_up(n, 8)), 8)
    n_pad = _round_up(n, tn)
    if n_pad // tn < 2 and n > 8:
        tn = _round_up((n_pad + 1) // 2, 8)
        n_pad = _round_up(n, tn)
    return tn, n_pad


def _apply_dropout(x, row_start, seed, keep_threshold, inv_keep):
    """Stateless dropout: hash of (global row, col, seed) -> keep mask.
    Deterministic and independent of tiling / kernel path."""
    n, d = x.shape
    rows = (jax.lax.broadcasted_iota(jnp.int32, (n, d), 0) + row_start
            ).astype(jnp.uint32)
    cols = jax.lax.broadcasted_iota(jnp.int32, (n, d), 1).astype(jnp.uint32)
    h = rows * jnp.uint32(0x9E3779B1) + cols
    h = h ^ (seed.astype(jnp.uint32) * jnp.uint32(0x85EBCA6B))
    # 2-round "lowbias32" finalizer (4 uint32 multiplies total).
    h = h ^ (h >> 16)
    h = h * jnp.uint32(0x7FEB352D)
    h = h ^ (h >> 15)
    h = h * jnp.uint32(0x846CA68B)
    h = h ^ (h >> 16)
    keep = h < jnp.uint32(keep_threshold)
    return jnp.where(keep, x * jnp.float32(inv_keep), jnp.float32(0.0))


# ---------------------------------------------------------------------------
# Path 1: VMEM-resident table, per-row gather-sum (small vocabularies).
# ---------------------------------------------------------------------------
def _gather_kernel(seed_ref, idx_ref, table_ref, out_ref, *,
                   padding_idx, num_labels, keep_threshold, inv_keep):
    # seed_ref  : SMEM (1,)        int32  (scalar prefetch)
    # idx_ref   : SMEM (n_pad*L,)  int32  (scalar prefetch) flattened label ids
    # table_ref : VMEM (v_pad, D)  f32    VMEM-resident embedding table
    # out_ref   : VMEM (tn, D)     f32
    i = pl.program_id(0)
    tn, d = out_ref.shape
    base = i * (tn * num_labels)
    for r in range(tn):                          # static unroll (tn is small)
        acc = jnp.zeros((1, d), jnp.float32)
        for l in range(num_labels):
            iv = idx_ref[base + r * num_labels + l]
            valid = (iv != padding_idx).astype(jnp.float32)
            row = table_ref[pl.ds(iv, 1), :].astype(jnp.float32)
            acc = acc + row * valid
        out_ref[r:r + 1, :] = acc
    if keep_threshold is not None:
        out_ref[...] = _apply_dropout(out_ref[...], i * tn, seed_ref[0],
                                      keep_threshold, inv_keep)


def _gather_forward(idx_flat, emb, seed_arr, *, padding_idx, keep_threshold,
                    inv_keep, tn_req=32):
    N, L = idx_flat.shape
    V, D = emb.shape
    tn, n_pad = _choose_row_tile(N, tn_req)
    if n_pad != N:
        idx_flat = jnp.pad(idx_flat, ((0, n_pad - N), (0, 0)),
                           constant_values=padding_idx)
    idx_1d = idx_flat.reshape(-1)

    v_pad = _round_up(V, 8)
    table = emb.astype(jnp.float32)              # full precision, stays in VMEM
    if v_pad != V:
        table = jnp.pad(table, ((0, v_pad - V), (0, 0)))

    kernel = functools.partial(_gather_kernel, padding_idx=int(padding_idx),
                               num_labels=L, keep_threshold=keep_threshold,
                               inv_keep=inv_keep)
    grid = (n_pad // tn,)
    return pl.pallas_call(
        kernel,
        out_shape=jax.ShapeDtypeStruct((n_pad, D), jnp.float32),
        grid_spec=pltpu.PrefetchScalarGridSpec(
            num_scalar_prefetch=2,
            grid=grid,
            in_specs=[pl.BlockSpec((v_pad, D), lambda i, seed, ids: (0, 0))],
            out_specs=pl.BlockSpec((tn, D), lambda i, seed, ids: (i, 0)),
        ),
        compiler_params=pltpu.CompilerParams(
            dimension_semantics=("parallel",)),
        cost_estimate=pl.CostEstimate(
            flops=int(2 * n_pad * L * D), transcendentals=0,
            bytes_accessed=int(n_pad * L * 4 + v_pad * D * 4 + n_pad * D * 4)),
    )(seed_arr, idx_1d, table)


# ---------------------------------------------------------------------------
# Path 2: one-hot-counts @ table on the MXU (large vocabularies).
# ---------------------------------------------------------------------------
def _matmul_kernel(seed_ref, idx_ref, emb_ref, out_ref, *,
                   padding_idx, vocab_chunk, keep_threshold, inv_keep):
    # seed_ref : SMEM (1,)      int32 (scalar prefetch)
    # idx_ref  : VMEM (tn, L)   int32 label ids (padding_idx = padded slot)
    # emb_ref  : VMEM (tv, D)   bf16/f32 vocab tile of the embedding table
    # out_ref  : VMEM (tn, D)   f32; doubles as the reduction accumulator
    i = pl.program_id(0)            # row-tile index  ("parallel")
    k = pl.program_id(1)            # vocab-tile index (reduction, last axis)
    num_k = pl.num_programs(1)
    tn, num_labels = idx_ref.shape
    tv, _ = emb_ref.shape

    @pl.when(k == 0)
    def _():
        out_ref[...] = jnp.zeros_like(out_ref)

    idx = idx_ref[...]
    idx = jnp.where(idx == padding_idx, jnp.int32(-1), idx)   # mask padded slots
    local = idx - k * tv                                       # tile-local ids

    # Chunked one-hot build: never materialize a (tn, tv) counts temporary.
    iota = jax.lax.broadcasted_iota(jnp.int32, (tn, vocab_chunk), 1)
    for c in range(tv // vocab_chunk):
        off = c * vocab_chunk
        counts = jnp.zeros((tn, vocab_chunk), jnp.int32)       # int32 accum
        for l in range(num_labels):
            counts = counts + (iota == (local[:, l:l + 1] - off)
                               ).astype(jnp.int32)
        out_ref[...] += jnp.dot(counts.astype(emb_ref.dtype),  # single cast
                                emb_ref[pl.ds(off, vocab_chunk), :],
                                preferred_element_type=jnp.float32)

    if keep_threshold is not None:
        @pl.when(k == num_k - 1)
        def _():
            out_ref[...] = _apply_dropout(out_ref[...], i * tn, seed_ref[0],
                                          keep_threshold, inv_keep)


def _matmul_forward(idx_flat, emb, seed_arr, *, padding_idx, keep_threshold,
                    inv_keep, tn, tv, vocab_chunk, compute_dtype):
    N, L = idx_flat.shape
    V, D = emb.shape

    tn, n_pad = _choose_row_tile(N, tn)
    if n_pad != N:
        idx_flat = jnp.pad(idx_flat, ((0, n_pad - N), (0, 0)),
                           constant_values=padding_idx)

    v8 = _round_up(V, 8)
    tv = _round_up(min(tv, v8), 8)
    vocab_chunk = _round_up(min(vocab_chunk, tv), 8)
    tv = _round_up(tv, vocab_chunk)                # whole number of lane chunks
    v_pad = _round_up(V, tv)

    table = emb.astype(compute_dtype)
    if v_pad != V:
        table = jnp.pad(table, ((0, v_pad - V), (0, 0)))

    kernel = functools.partial(_matmul_kernel, padding_idx=int(padding_idx),
                               vocab_chunk=vocab_chunk,
                               keep_threshold=keep_threshold,
                               inv_keep=inv_keep)
    grid = (n_pad // tn, v_pad // tv)
    bytes_accessed = int(n_pad * L * 4
                         + grid[0] * v_pad * D * table.dtype.itemsize
                         + n_pad * D * 4)
    return pl.pallas_call(
        kernel,
        out_shape=jax.ShapeDtypeStruct((n_pad, D), jnp.float32),
        grid_spec=pltpu.PrefetchScalarGridSpec(
            num_scalar_prefetch=1,
            grid=grid,
            in_specs=[
                pl.BlockSpec((tn, L), lambda i, k, seed: (i, 0)),    # indices
                pl.BlockSpec((tv, D), lambda i, k, seed: (k, 0)),    # table tile
            ],
            out_specs=pl.BlockSpec((tn, D), lambda i, k, seed: (i, 0)),
        ),
        compiler_params=pltpu.CompilerParams(
            dimension_semantics=("parallel", "arbitrary")),
        cost_estimate=pl.CostEstimate(
            flops=int(2 * n_pad * v_pad * D), transcendentals=0,
            bytes_accessed=bytes_accessed),
    )(seed_arr, idx_flat, table)


# ---------------------------------------------------------------------------
# Public wrapper.
# ---------------------------------------------------------------------------
def multilabel_embedding(idx, emb, seed, *, p_drop=0.5, training=True,
                         padding_idx=0, tn=512, tv=512, vocab_chunk=256,
                         compute_dtype=jnp.bfloat16, force_matmul=False):
    """idx: (B, S, L) int32 label ids padded with padding_idx,
    emb: (V, D) float32 embedding table  ->  (B, S, D) float32."""
    B, S, L = idx.shape
    V, D = emb.shape
    N = B * S
    idx_flat = idx.reshape(N, L).astype(jnp.int32)

    use_dropout = training and (p_drop is not None) and (float(p_drop) > 0.0)
    if use_dropout:
        keep = 1.0 - float(p_drop)
        keep_threshold = min(int(keep * (2 ** 32)), 2 ** 32 - 1)
        inv_keep = 1.0 / keep
    else:
        keep_threshold, inv_keep = None, 1.0
    seed_arr = jnp.asarray([seed], dtype=jnp.int32)

    small_table = _round_up(V, 8) * D * 4 <= (4 << 20)   # table (x2 bufs) in VMEM
    small_idx = N * L * 4 <= (32 << 10)                   # ids fit in SMEM
    if small_table and small_idx and not force_matmul:
        out_flat = _gather_forward(idx_flat, emb, seed_arr,
                                   padding_idx=padding_idx,
                                   keep_threshold=keep_threshold,
                                   inv_keep=inv_keep)
    else:
        out_flat = _matmul_forward(idx_flat, emb, seed_arr,
                                   padding_idx=padding_idx,
                                   keep_threshold=keep_threshold,
                                   inv_keep=inv_keep, tn=tn, tv=tv,
                                   vocab_chunk=vocab_chunk,
                                   compute_dtype=compute_dtype)
    return out_flat[:N].reshape(B, S, D)


def _reference_sum(idx, emb):
    # Pure-JAX reference: gather + sum over the label axis.
    return jnp.take(emb, idx, axis=0).astype(jnp.float32).sum(axis=2)


if __name__ == "__main__":
    V, D = 64, 128
    B, S, L = 2, 8, 4
    P_DROP = 0.5

    key = jax.random.PRNGKey(0)
    k_emb, k_idx = jax.random.split(key)

    # nn.Embedding init: N(0,1), padding_idx row zeroed.
    emb = jax.random.normal(k_emb, (V, D), dtype=jnp.float32)
    emb = emb.at[0].set(0.0)

    idx = jax.random.randint(k_idx, (B, S, L), 0, V, dtype=jnp.int32)
    # Pad the last label slot of every position with padding_idx=0
    # (emulating variable-length label lists).
    idx = idx.at[:, :, -1].set(0)

    ref_f32 = _reference_sum(idx, emb)
    ref_bf16 = _reference_sum(idx, emb.astype(jnp.bfloat16))

    # --- eval (dropout off) ------------------------------------------------
    # gather path (auto-selected: table fits in VMEM) -- f32 exact
    out_eval_g = multilabel_embedding(idx, emb, seed=0, p_drop=P_DROP,
                                      training=False)
    jax.block_until_ready(out_eval_g)
    assert out_eval_g.shape == (B, S, D)
    assert jnp.allclose(out_eval_g, ref_f32, atol=1e-4), "gather path mismatch"

    # matmul path (forced) -- bf16 table streamed, f32 accumulation
    out_eval_m = multilabel_embedding(idx, emb, seed=0, p_drop=P_DROP,
                                      training=False, force_matmul=True)
    jax.block_until_ready(out_eval_m)
    assert jnp.allclose(out_eval_m, ref_bf16, atol=1e-3), "matmul path mismatch"
    assert jnp.allclose(out_eval_m, ref_f32, atol=0.25), "bf16 error too large"

    # --- training (module defaults: p=0.5, training=True) -------------------
    for forced, out_eval in ((False, out_eval_g), (True, out_eval_m)):
        out_train = multilabel_embedding(idx, emb, seed=1234, p_drop=P_DROP,
                                         training=True, force_matmul=forced)
        jax.block_until_ready(out_train)
        assert out_train.shape == (B, S, D)
        kept = out_train != 0.0
        assert jnp.allclose(jnp.where(kept, out_train, 0.0),
                            jnp.where(kept, out_eval * 2.0, 0.0),
                            atol=1e-3), "dropout scaling mismatch"
        frac = float(jnp.mean(kept.astype(jnp.float32)))
        assert 0.2 < frac < 0.8, f"dropout keep fraction off: {frac}"

    print("KERNEL_OK")
</pallas_src>

<mosaic_0001>
module attributes {stable_mosaic.version = 11 : i64} {
  func.func @_gather_kernel(%arg0: i32, %arg1: memref<1xi32, #tpu.memory_space<smem>>, %arg2: memref<64xi32, #tpu.memory_space<smem>>, %arg3: memref<64x128xf32, #tpu.memory_space<vmem>>, %arg4: memref<8x128xf32, #tpu.memory_space<vmem>>) attributes {dimension_semantics = [#tpu.dimension_semantics<parallel>], iteration_bounds = array<i64: 2>, scalar_prefetch = 2 : i64, scratch_operands = 0 : i64, tpu.core_type = #tpu.core_type<tc>, window_params = [{pipeline_mode = #tpu.pipeline_mode<synchronous>, transform_indices = @transform_0, window_bounds = array<i64: 64, 128>}, {transform_indices = @transform_1, window_bounds = array<i64: 8, 128>}]} {
    %c32_i32 = arith.constant 32 : i32
    %0 = arith.muli %arg0, %c32_i32 : i32
    %cst = arith.constant 0.000000e+00 : f32
    %1 = vector.broadcast %cst : f32 to vector<1x128xf32>
    %c0_i32 = arith.constant 0 : i32
    %2 = arith.addi %0, %c0_i32 : i32
    %c0_i32_0 = arith.constant 0 : i32
    %3 = arith.addi %2, %c0_i32_0 : i32
    %4 = arith.index_cast %3 : i32 to index
    %5 = memref.load %arg2[%4] : memref<64xi32, #tpu.memory_space<smem>>
    %c0_i32_1 = arith.constant 0 : i32
    %6 = arith.cmpi ne, %5, %c0_i32_1 : i32
    %7 = arith.extui %6 : i1 to i32
    %8 = arith.sitofp %7 : i32 to f32
    %9 = arith.index_cast %5 : i32 to index
    %c0 = arith.constant 0 : index
    %10 = vector.load %arg3[%9, %c0] : memref<64x128xf32, #tpu.memory_space<vmem>>, vector<1x128xf32>
    %11 = vector.broadcast %8 : f32 to vector<1x128xf32>
    %12 = arith.mulf %10, %11 : vector<1x128xf32>
    %13 = arith.addf %1, %12 : vector<1x128xf32>
    %c0_i32_2 = arith.constant 0 : i32
    %14 = arith.addi %0, %c0_i32_2 : i32
    %c1_i32 = arith.constant 1 : i32
    %15 = arith.addi %14, %c1_i32 : i32
    %16 = arith.index_cast %15 : i32 to index
    %17 = memref.load %arg2[%16] : memref<64xi32, #tpu.memory_space<smem>>
    %c0_i32_3 = arith.constant 0 : i32
    %18 = arith.cmpi ne, %17, %c0_i32_3 : i32
    %19 = arith.extui %18 : i1 to i32
    %20 = arith.sitofp %19 : i32 to f32
    %21 = arith.index_cast %17 : i32 to index
    %c0_4 = arith.constant 0 : index
    %22 = vector.load %arg3[%21, %c0_4] : memref<64x128xf32, #tpu.memory_space<vmem>>, vector<1x128xf32>
    %23 = vector.broadcast %20 : f32 to vector<1x128xf32>
    %24 = arith.mulf %22, %23 : vector<1x128xf32>
    %25 = arith.addf %13, %24 : vector<1x128xf32>
    %c0_i32_5 = arith.constant 0 : i32
    %26 = arith.addi %0, %c0_i32_5 : i32
    %c2_i32 = arith.constant 2 : i32
    %27 = arith.addi %26, %c2_i32 : i32
    %28 = arith.index_cast %27 : i32 to index
    %29 = memref.load %arg2[%28] : memref<64xi32, #tpu.memory_space<smem>>
    %c0_i32_6 = arith.constant 0 : i32
    %30 = arith.cmpi ne, %29, %c0_i32_6 : i32
    %31 = arith.extui %30 : i1 to i32
    %32 = arith.sitofp %31 : i32 to f32
    %33 = arith.index_cast %29 : i32 to index
    %c0_7 = arith.constant 0 : index
    %34 = vector.load %arg3[%33, %c0_7] : memref<64x128xf32, #tpu.memory_space<vmem>>, vector<1x128xf32>
    %35 = vector.broadcast %32 : f32 to vector<1x128xf32>
    %36 = arith.mulf %34, %35 : vector<1x128xf32>
    %37 = arith.addf %25, %36 : vector<1x128xf32>
    %c0_i32_8 = arith.constant 0 : i32
    %38 = arith.addi %0, %c0_i32_8 : i32
    %c3_i32 = arith.constant 3 : i32
    %39 = arith.addi %38, %c3_i32 : i32
    %40 = arith.index_cast %39 : i32 to index
    %41 = memref.load %arg2[%40] : memref<64xi32, #tpu.memory_space<smem>>
    %c0_i32_9 = arith.constant 0 : i32
    %42 = arith.cmpi ne, %41, %c0_i32_9 : i32
    %43 = arith.extui %42 : i1 to i32
    %44 = arith.sitofp %43 : i32 to f32
    %45 = arith.index_cast %41 : i32 to index
    %c0_10 = arith.constant 0 : index
    %46 = vector.load %arg3[%45, %c0_10] : memref<64x128xf32, #tpu.memory_space<vmem>>, vector<1x128xf32>
    %47 = vector.broadcast %44 : f32 to vector<1x128xf32>
    %48 = arith.mulf %46, %47 : vector<1x128xf32>
    %49 = arith.addf %37, %48 : vector<1x128xf32>
    %c0_11 = arith.constant 0 : index
    %c0_12 = arith.constant 0 : index
    %50 = vector.load %arg4[%c0_11, %c0_12] : memref<8x128xf32, #tpu.memory_space<vmem>>, vector<1x128xf32>
    tpu.vector_store %arg4[%c0_11, %c0_12], %49 {strides = array<i32>} : memref<8x128xf32, #tpu.memory_space<vmem>>, vector<1x128xf32>,
    %cst_13 = arith.constant 0.000000e+00 : f32
    %51 = vector.broadcast %cst_13 : f32 to vector<1x128xf32>
    %c4_i32 = arith.constant 4 : i32
    %52 = arith.addi %0, %c4_i32 : i32
    %c0_i32_14 = arith.constant 0 : i32
    %53 = arith.addi %52, %c0_i32_14 : i32
    %54 = arith.index_cast %53 : i32 to index
    %55 = memref.load %arg2[%54] : memref<64xi32, #tpu.memory_space<smem>>
    %c0_i32_15 = arith.constant 0 : i32
    %56 = arith.cmpi ne, %55, %c0_i32_15 : i32
    %57 = arith.extui %56 : i1 to i32
    %58 = arith.sitofp %57 : i32 to f32
    %59 = arith.index_cast %55 : i32 to index
    %c0_16 = arith.constant 0 : index
    %60 = vector.load %arg3[%59, %c0_16] : memref<64x128xf32, #tpu.memory_space<vmem>>, vector<1x128xf32>
    %61 = vector.broadcast %58 : f32 to vector<1x128xf32>
    %62 = arith.mulf %60, %61 : vector<1x128xf32>
    %63 = arith.addf %51, %62 : vector<1x128xf32>
    %c4_i32_17 = arith.constant 4 : i32
    %64 = arith.addi %0, %c4_i32_17 : i32
    %c1_i32_18 = arith.constant 1 : i32
    %65 = arith.addi %64, %c1_i32_18 : i32
    %66 = arith.index_cast %65 : i32 to index
    %67 = memref.load %arg2[%66] : memref<64xi32, #tpu.memory_space<smem>>
    %c0_i32_19 = arith.constant 0 : i32
    %68 = arith.cmpi ne, %67, %c0_i32_19 : i32
    %69 = arith.extui %68 : i1 to i32
    %70 = arith.sitofp %69 : i32 to f32
    %71 = arith.index_cast %67 : i32 to index
    %c0_20 = arith.constant 0 : index
    %72 = vector.load %arg3[%71, %c0_20] : memref<64x128xf32, #tpu.memory_space<vmem>>, vector<1x128xf32>
    %73 = vector.broadcast %70 : f32 to vector<1x128xf32>
    %74 = arith.mulf %72, %73 : vector<1x128xf32>
    %75 = arith.addf %63, %74 : vector<1x128xf32>
    %c4_i32_21 = arith.constant 4 : i32
    %76 = arith.addi %0, %c4_i32_21 : i32
    %c2_i32_22 = arith.constant 2 : i32
    %77 = arith.addi %76, %c2_i32_22 : i32
    %78 = arith.index_cast %77 : i32 to index
    %79 = memref.load %arg2[%78] : memref<64xi32, #tpu.memory_space<smem>>
    %c0_i32_23 = arith.constant 0 : i32
    %80 = arith.cmpi ne, %79, %c0_i32_23 : i32
    %81 = arith.extui %80 : i1 to i32
    %82 = arith.sitofp %81 : i32 to f32
    %83 = arith.index_cast %79 : i32 to index
    %c0_24 = arith.constant 0 : index
    %84 = vector.load %arg3[%83, %c0_24] : memref<64x128xf32, #tpu.memory_space<vmem>>, vector<1x128xf32>
    %85 = vector.broadcast %82 : f32 to vector<1x128xf32>
    %86 = arith.mulf %84, %85 : vector<1x128xf32>
    %87 = arith.addf %75, %86 : vector<1x128xf32>
    %c4_i32_25 = arith.constant 4 : i32
    %88 = arith.addi %0, %c4_i32_25 : i32
    %c3_i32_26 = arith.constant 3 : i32
    %89 = arith.addi %88, %c3_i32_26 : i32
    %90 = arith.index_cast %89 : i32 to index
    %91 = memref.load %arg2[%90] : memref<64xi32, #tpu.memory_space<smem>>
    %c0_i32_27 = arith.constant 0 : i32
    %92 = arith.cmpi ne, %91, %c0_i32_27 : i32
    %93 = arith.extui %92 : i1 to i32
    %94 = arith.sitofp %93 : i32 to f32
    %95 = arith.index_cast %91 : i32 to index
    %c0_28 = arith.constant 0 : index
    %96 = vector.load %arg3[%95, %c0_28] : memref<64x128xf32, #tpu.memory_space<vmem>>, vector<1x128xf32>
    %97 = vector.broadcast %94 : f32 to vector<1x128xf32>
    %98 = arith.mulf %96, %97 : vector<1x128xf32>
    %99 = arith.addf %87, %98 : vector<1x128xf32>
    %c1 = arith.constant 1 : index
    %c0_29 = arith.constant 0 : index
    %100 = vector.load %arg4[%c1, %c0_29] : memref<8x128xf32, #tpu.memory_space<vmem>>, vector<1x128xf32>
    tpu.vector_store %arg4[%c1, %c0_29], %99 {strides = array<i32>} : memref<8x128xf32, #tpu.memory_space<vmem>>, vector<1x128xf32>,
    %cst_30 = arith.constant 0.000000e+00 : f32
    %101 = vector.broadcast %cst_30 : f32 to vector<1x128xf32>
    %c8_i32 = arith.constant 8 : i32
    %102 = arith.addi %0, %c8_i32 : i32
    %c0_i32_31 = arith.constant 0 : i32
    %103 = arith.addi %102, %c0_i32_31 : i32
    %104 = arith.index_cast %103 : i32 to index
    %105 = memref.load %arg2[%104] : memref<64xi32, #tpu.memory_space<smem>>
    %c0_i32_32 = arith.constant 0 : i32
    %106 = arith.cmpi ne, %105, %c0_i32_32 : i32
    %107 = arith.extui %106 : i1 to i32
    %108 = arith.sitofp %107 : i32 to f32
    %109 = arith.index_cast %105 : i32 to index
    %c0_33 = arith.constant 0 : index
    %110 = vector.load %arg3[%109, %c0_33] : memref<64x128xf32, #tpu.memory_space<vmem>>, vector<1x128xf32>
    %111 = vector.broadcast %108 : f32 to vector<1x128xf32>
    %112 = arith.mulf %110, %111 : vector<1x128xf32>
    %113 = arith.addf %101, %112 : vector<1x128xf32>
    %c8_i32_34 = arith.constant 8 : i32
    %114 = arith.addi %0, %c8_i32_34 : i32
    %c1_i32_35 = arith.constant 1 : i32
    %115 = arith.addi %114, %c1_i32_35 : i32
    %116 = arith.index_cast %115 : i32 to index
    %117 = memref.load %arg2[%116] : memref<64xi32, #tpu.memory_space<smem>>
    %c0_i32_36 = arith.constant 0 : i32
    %118 = arith.cmpi ne, %117, %c0_i32_36 : i32
    %119 = arith.extui %118 : i1 to i32
    %120 = arith.sitofp %119 : i32 to f32
    %121 = arith.index_cast %117 : i32 to index
    %c0_37 = arith.constant 0 : index
    %122 = vector.load %arg3[%121, %c0_37] : memref<64x128xf32, #tpu.memory_space<vmem>>, vector<1x128xf32>
    %123 = vector.broadcast %120 : f32 to vector<1x128xf32>
    %124 = arith.mulf %122, %123 : vector<1x128xf32>
    %125 = arith.addf %113, %124 : vector<1x128xf32>
    %c8_i32_38 = arith.constant 8 : i32
    %126 = arith.addi %0, %c8_i32_38 : i32
    %c2_i32_39 = arith.constant 2 : i32
    %127 = arith.addi %126, %c2_i32_39 : i32
    %128 = arith.index_cast %127 : i32 to index
    %129 = memref.load %arg2[%128] : memref<64xi32, #tpu.memory_space<smem>>
    %c0_i32_40 = arith.constant 0 : i32
    %130 = arith.cmpi ne, %129, %c0_i32_40 : i32
    %131 = arith.extui %130 : i1 to i32
    %132 = arith.sitofp %131 : i32 to f32
    %133 = arith.index_cast %129 : i32 to index
    %c0_41 = arith.constant 0 : index
    %134 = vector.load %arg3[%133, %c0_41] : memref<64x128xf32, #tpu.memory_space<vmem>>, vector<1x128xf32>
    %135 = vector.broadcast %132 : f32 to vector<1x128xf32>
    %136 = arith.mulf %134, %135 : vector<1x128xf32>
    %137 = arith.addf %125, %136 : vector<1x128xf32>
    %c8_i32_42 = arith.constant 8 : i32
    %138 = arith.addi %0, %c8_i32_42 : i32
    %c3_i32_43 = arith.constant 3 : i32
    %139 = arith.addi %138, %c3_i32_43 : i32
    %140 = arith.index_cast %139 : i32 to index
    %141 = memref.load %arg2[%140] : memref<64xi32, #tpu.memory_space<smem>>
    %c0_i32_44 = arith.constant 0 : i32
    %142 = arith.cmpi ne, %141, %c0_i32_44 : i32
    %143 = arith.extui %142 : i1 to i32
    %144 = arith.sitofp %143 : i32 to f32
    %145 = arith.index_cast %141 : i32 to index
    %c0_45 = arith.constant 0 : index
    %146 = vector.load %arg3[%145, %c0_45] : memref<64x128xf32, #tpu.memory_space<vmem>>, vector<1x128xf32>
    %147 = vector.broadcast %144 : f32 to vector<1x128xf32>
    %148 = arith.mulf %146, %147 : vector<1x128xf32>
    %149 = arith.addf %137, %148 : vector<1x128xf32>
    %c2 = arith.constant 2 : index
    %c0_46 = arith.constant 0 : index
    %150 = vector.load %arg4[%c2, %c0_46] : memref<8x128xf32, #tpu.memory_space<vmem>>, vector<1x128xf32>
    tpu.vector_store %arg4[%c2, %c0_46], %149 {strides = array<i32>} : memref<8x128xf32, #tpu.memory_space<vmem>>, vector<1x128xf32>,
    %cst_47 = arith.constant 0.000000e+00 : f32
    %151 = vector.broadcast %cst_47 : f32 to vector<1x128xf32>
    %c12_i32 = arith.constant 12 : i32
    %152 = arith.addi %0, %c12_i32 : i32
    %c0_i32_48 = arith.constant 0 : i32
    %153 = arith.addi %152, %c0_i32_48 : i32
    %154 = arith.index_cast %153 : i32 to index
    %155 = memref.load %arg2[%154] : memref<64xi32, #tpu.memory_space<smem>>
    %c0_i32_49 = arith.constant 0 : i32
    %156 = arith.cmpi ne, %155, %c0_i32_49 : i32
    %157 = arith.extui %156 : i1 to i32
    %158 = arith.sitofp %157 : i32 to f32
    %159 = arith.index_cast %155 : i32 to index
    %c0_50 = arith.constant 0 : index
    %160 = vector.load %arg3[%159, %c0_50] : memref<64x128xf32, #tpu.memory_space<vmem>>, vector<1x128xf32>
    %161 = vector.broadcast %158 : f32 to vector<1x128xf32>
    %162 = arith.mulf %160, %161 : vector<1x128xf32>
    %163 = arith.addf %151, %162 : vector<1x128xf32>
    %c12_i32_51 = arith.constant 12 : i32
    %164 = arith.addi %0, %c12_i32_51 : i32
    %c1_i32_52 = arith.constant 1 : i32
    %165 = arith.addi %164, %c1_i32_52 : i32
    %166 = arith.index_cast %165 : i32 to index
    %167 = memref.load %arg2[%166] : memref<64xi32, #tpu.memory_space<smem>>
    %c0_i32_53 = arith.constant 0 : i32
    %168 = arith.cmpi ne, %167, %c0_i32_53 : i32
    %169 = arith.extui %168 : i1 to i32
    %170 = arith.sitofp %169 : i32 to f32
    %171 = arith.index_cast %167 : i32 to index
    %c0_54 = arith.constant 0 : index
    %172 = vector.load %arg3[%171, %c0_54] : memref<64x128xf32, #tpu.memory_space<vmem>>, vector<1x128xf32>
    %173 = vector.broadcast %170 : f32 to vector<1x128xf32>
    %174 = arith.mulf %172, %173 : vector<1x128xf32>
    %175 = arith.addf %163, %174 : vector<1x128xf32>
    %c12_i32_55 = arith.constant 12 : i32
    %176 = arith.addi %0, %c12_i32_55 : i32
    %c2_i32_56 = arith.constant 2 : i32
    %177 = arith.addi %176, %c2_i32_56 : i32
    %178 = arith.index_cast %177 : i32 to index
    %179 = memref.load %arg2[%178] : memref<64xi32, #tpu.memory_space<smem>>
    %c0_i32_57 = arith.constant 0 : i32
    %180 = arith.cmpi ne, %179, %c0_i32_57 : i32
    %181 = arith.extui %180 : i1 to i32
    %182 = arith.sitofp %181 : i32 to f32
    %183 = arith.index_cast %179 : i32 to index
    %c0_58 = arith.constant 0 : index
    %184 = vector.load %arg3[%183, %c0_58] : memref<64x128xf32, #tpu.memory_space<vmem>>, vector<1x128xf32>
    %185 = vector.broadcast %182 : f32 to vector<1x128xf32>
    %186 = arith.mulf %184, %185 : vector<1x128xf32>
    %187 = arith.addf %175, %186 : vector<1x128xf32>
    %c12_i32_59 = arith.constant 12 : i32
    %188 = arith.addi %0, %c12_i32_59 : i32
    %c3_i32_60 = arith.constant 3 : i32
    %189 = arith.addi %188, %c3_i32_60 : i32
    %190 = arith.index_cast %189 : i32 to index
    %191 = memref.load %arg2[%190] : memref<64xi32, #tpu.memory_space<smem>>
    %c0_i32_61 = arith.constant 0 : i32
    %192 = arith.cmpi ne, %191, %c0_i32_61 : i32
    %193 = arith.extui %192 : i1 to i32
    %194 = arith.sitofp %193 : i32 to f32
    %195 = arith.index_cast %191 : i32 to index
    %c0_62 = arith.constant 0 : index
    %196 = vector.load %arg3[%195, %c0_62] : memref<64x128xf32, #tpu.memory_space<vmem>>, vector<1x128xf32>
    %197 = vector.broadcast %194 : f32 to vector<1x128xf32>
    %198 = arith.mulf %196, %197 : vector<1x128xf32>
    %199 = arith.addf %187, %198 : vector<1x128xf32>
    %c3 = arith.constant 3 : index
    %c0_63 = arith.constant 0 : index
    %200 = vector.load %arg4[%c3, %c0_63] : memref<8x128xf32, #tpu.memory_space<vmem>>, vector<1x128xf32>
    tpu.vector_store %arg4[%c3, %c0_63], %199 {strides = array<i32>} : memref<8x128xf32, #tpu.memory_space<vmem>>, vector<1x128xf32>,
    %cst_64 = arith.constant 0.000000e+00 : f32
    %201 = vector.broadcast %cst_64 : f32 to vector<1x128xf32>
    %c16_i32 = arith.constant 16 : i32
    %202 = arith.addi %0, %c16_i32 : i32
    %c0_i32_65 = arith.constant 0 : i32
    %203 = arith.addi %202, %c0_i32_65 : i32
    %204 = arith.index_cast %203 : i32 to index
    %205 = memref.load %arg2[%204] : memref<64xi32, #tpu.memory_space<smem>>
    %c0_i32_66 = arith.constant 0 : i32
    %206 = arith.cmpi ne, %205, %c0_i32_66 : i32
    %207 = arith.extui %206 : i1 to i32
    %208 = arith.sitofp %207 : i32 to f32
    %209 = arith.index_cast %205 : i32 to index
    %c0_67 = arith.constant 0 : index
    %210 = vector.load %arg3[%209, %c0_67] : memref<64x128xf32, #tpu.memory_space<vmem>>, vector<1x128xf32>
    %211 = vector.broadcast %208 : f32 to vector<1x128xf32>
    %212 = arith.mulf %210, %211 : vector<1x128xf32>
    %213 = arith.addf %201, %212 : vector<1x128xf32>
    %c16_i32_68 = arith.constant 16 : i32
    %214 = arith.addi %0, %c16_i32_68 : i32
    %c1_i32_69 = arith.constant 1 : i32
    %215 = arith.addi %214, %c1_i32_69 : i32
    %216 = arith.index_cast %215 : i32 to index
    %217 = memref.load %arg2[%216] : memref<64xi32, #tpu.memory_space<smem>>
    %c0_i32_70 = arith.constant 0 : i32
    %218 = arith.cmpi ne, %217, %c0_i32_70 : i32
    %219 = arith.extui %218 : i1 to i32
    %220 = arith.sitofp %219 : i32 to f32
    %221 = arith.index_cast %217 : i32 to index
    %c0_71 = arith.constant 0 : index
    %222 = vector.load %arg3[%221, %c0_71] : memref<64x128xf32, #tpu.memory_space<vmem>>, vector<1x128xf32>
    %223 = vector.broadcast %220 : f32 to vector<1x128xf32>
    %224 = arith.mulf %222, %223 : vector<1x128xf32>
    %225 = arith.addf %213, %224 : vector<1x128xf32>
    %c16_i32_72 = arith.constant 16 : i32
    %226 = arith.addi %0, %c16_i32_72 : i32
    %c2_i32_73 = arith.constant 2 : i32
    %227 = arith.addi %226, %c2_i32_73 : i32
    %228 = arith.index_cast %227 : i32 to index
    %229 = memref.load %arg2[%228] : memref<64xi32, #tpu.memory_space<smem>>
    %c0_i32_74 = arith.constant 0 : i32
    %230 = arith.cmpi ne, %229, %c0_i32_74 : i32
    %231 = arith.extui %230 : i1 to i32
    %232 = arith.sitofp %231 : i32 to f32
    %233 = arith.index_cast %229 : i32 to index
    %c0_75 = arith.constant 0 : index
    %234 = vector.load %arg3[%233, %c0_75] : memref<64x128xf32, #tpu.memory_space<vmem>>, vector<1x128xf32>
    %235 = vector.broadcast %232 : f32 to vector<1x128xf32>
    %236 = arith.mulf %234, %235 : vector<1x128xf32>
    %237 = arith.addf %225, %236 : vector<1x128xf32>
    %c16_i32_76 = arith.constant 16 : i32
    %238 = arith.addi %0, %c16_i32_76 : i32
    %c3_i32_77 = arith.constant 3 : i32
    %239 = arith.addi %238, %c3_i32_77 : i32
    %240 = arith.index_cast %239 : i32 to index
    %241 = memref.load %arg2[%240] : memref<64xi32, #tpu.memory_space<smem>>
    %c0_i32_78 = arith.constant 0 : i32
    %242 = arith.cmpi ne, %241, %c0_i32_78 : i32
    %243 = arith.extui %242 : i1 to i32
    %244 = arith.sitofp %243 : i32 to f32
    %245 = arith.index_cast %241 : i32 to index
    %c0_79 = arith.constant 0 : index
    %246 = vector.load %arg3[%245, %c0_79] : memref<64x128xf32, #tpu.memory_space<vmem>>, vector<1x128xf32>
    %247 = vector.broadcast %244 : f32 to vector<1x128xf32>
    %248 = arith.mulf %246, %247 : vector<1x128xf32>
    %249 = arith.addf %237, %248 : vector<1x128xf32>
    %c4 = arith.constant 4 : index
    %c0_80 = arith.constant 0 : index
    %250 = vector.load %arg4[%c4, %c0_80] : memref<8x128xf32, #tpu.memory_space<vmem>>, vector<1x128xf32>
    tpu.vector_store %arg4[%c4, %c0_80], %249 {strides = array<i32>} : memref<8x128xf32, #tpu.memory_space<vmem>>, vector<1x128xf32>,
    %cst_81 = arith.constant 0.000000e+00 : f32
    %251 = vector.broadcast %cst_81 : f32 to vector<1x128xf32>
    %c20_i32 = arith.constant 20 : i32
    %252 = arith.addi %0, %c20_i32 : i32
    %c0_i32_82 = arith.constant 0 : i32
    %253 = arith.addi %252, %c0_i32_82 : i32
    %254 = arith.index_cast %253 : i32 to index
    %255 = memref.load %arg2[%254] : memref<64xi32, #tpu.memory_space<smem>>
    %c0_i32_83 = arith.constant 0 : i32
    %256 = arith.cmpi ne, %255, %c0_i32_83 : i32
    %257 = arith.extui %256 : i1 to i32
    %258 = arith.sitofp %257 : i32 to f32
    %259 = arith.index_cast %255 : i32 to index
    %c0_84 = arith.constant 0 : index
    %260 = vector.load %arg3[%259, %c0_84] : memref<64x128xf32, #tpu.memory_space<vmem>>, vector<1x128xf32>
    %261 = vector.broadcast %258 : f32 to vector<1x128xf32>
    %262 = arith.mulf %260, %261 : vector<1x128xf32>
    %263 = arith.addf %251, %262 : vector<1x128xf32>
    %c20_i32_85 = arith.constant 20 : i32
    %264 = arith.addi %0, %c20_i32_85 : i32
    %c1_i32_86 = arith.constant 1 : i32
    %265 = arith.addi %264, %c1_i32_86 : i32
    %266 = arith.index_cast %265 : i32 to index
    %267 = memref.load %arg2[%266] : memref<64xi32, #tpu.memory_space<smem>>
    %c0_i32_87 = arith.constant 0 : i32
    %268 = arith.cmpi ne, %267, %c0_i32_87 : i32
    %269 = arith.extui %268 : i1 to i32
    %270 = arith.sitofp %269 : i32 to f32
    %271 = arith.index_cast %267 : i32 to index
    %c0_88 = arith.constant 0 : index
    %272 = vector.load %arg3[%271, %c0_88] : memref<64x128xf32, #tpu.memory_space<vmem>>, vector<1x128xf32>
    %273 = vector.broadcast %270 : f32 to vector<1x128xf32>
    %274 = arith.mulf %272, %273 : vector<1x128xf32>
    %275 = arith.addf %263, %274 : vector<1x128xf32>
    %c20_i32_89 = arith.constant 20 : i32
    %276 = arith.addi %0, %c20_i32_89 : i32
    %c2_i32_90 = arith.constant 2 : i32
    %277 = arith.addi %276, %c2_i32_90 : i32
    %278 = arith.index_cast %277 : i32 to index
    %279 = memref.load %arg2[%278] : memref<64xi32, #tpu.memory_space<smem>>
    %c0_i32_91 = arith.constant 0 : i32
    %280 = arith.cmpi ne, %279, %c0_i32_91 : i32
    %281 = arith.extui %280 : i1 to i32
    %282 = arith.sitofp %281 : i32 to f32
    %283 = arith.index_cast %279 : i32 to index
    %c0_92 = arith.constant 0 : index
    %284 = vector.load %arg3[%283, %c0_92] : memref<64x128xf32, #tpu.memory_space<vmem>>, vector<1x128xf32>
    %285 = vector.broadcast %282 : f32 to vector<1x128xf32>
    %286 = arith.mulf %284, %285 : vector<1x128xf32>
    %287 = arith.addf %275, %286 : vector<1x128xf32>
    %c20_i32_93 = arith.constant 20 : i32
    %288 = arith.addi %0, %c20_i32_93 : i32
    %c3_i32_94 = arith.constant 3 : i32
    %289 = arith.addi %288, %c3_i32_94 : i32
    %290 = arith.index_cast %289 : i32 to index
    %291 = memref.load %arg2[%290] : memref<64xi32, #tpu.memory_space<smem>>
    %c0_i32_95 = arith.constant 0 : i32
    %292 = arith.cmpi ne, %291, %c0_i32_95 : i32
    %293 = arith.extui %292 : i1 to i32
    %294 = arith.sitofp %293 : i32 to f32
    %295 = arith.index_cast %291 : i32 to index
    %c0_96 = arith.constant 0 : index
    %296 = vector.load %arg3[%295, %c0_96] : memref<64x128xf32, #tpu.memory_space<vmem>>, vector<1x128xf32>
    %297 = vector.broadcast %294 : f32 to vector<1x128xf32>
    %298 = arith.mulf %296, %297 : vector<1x128xf32>
    %299 = arith.addf %287, %298 : vector<1x128xf32>
    %c5 = arith.constant 5 : index
    %c0_97 = arith.constant 0 : index
    %300 = vector.load %arg4[%c5, %c0_97] : memref<8x128xf32, #tpu.memory_space<vmem>>, vector<1x128xf32>
    tpu.vector_store %arg4[%c5, %c0_97], %299 {strides = array<i32>} : memref<8x128xf32, #tpu.memory_space<vmem>>, vector<1x128xf32>,
    %cst_98 = arith.constant 0.000000e+00 : f32
    %301 = vector.broadcast %cst_98 : f32 to vector<1x128xf32>
    %c24_i32 = arith.constant 24 : i32
    %302 = arith.addi %0, %c24_i32 : i32
    %c0_i32_99 = arith.constant 0 : i32
    %303 = arith.addi %302, %c0_i32_99 : i32
    %304 = arith.index_cast %303 : i32 to index
    %305 = memref.load %arg2[%304] : memref<64xi32, #tpu.memory_space<smem>>
    %c0_i32_100 = arith.constant 0 : i32
    %306 = arith.cmpi ne, %305, %c0_i32_100 : i32
    %307 = arith.extui %306 : i1 to i32
    %308 = arith.sitofp %307 : i32 to f32
    %309 = arith.index_cast %305 : i32 to index
    %c0_101 = arith.constant 0 : index
    %310 = vector.load %arg3[%309, %c0_101] : memref<64x128xf32, #tpu.memory_space<vmem>>, vector<1x128xf32>
    %311 = vector.broadcast %308 : f32 to vector<1x128xf32>
    %312 = arith.mulf %310, %311 : vector<1x128xf32>
    %313 = arith.addf %301, %312 : vector<1x128xf32>
    %c24_i32_102 = arith.constant 24 : i32
    %314 = arith.addi %0, %c24_i32_102 : i32
    %c1_i32_103 = arith.constant 1 : i32
    %315 = arith.addi %314, %c1_i32_103 : i32
    %316 = arith.index_cast %315 : i32 to index
    %317 = memref.load %arg2[%316] : memref<64xi32, #tpu.memory_space<smem>>
    %c0_i32_104 = arith.constant 0 : i32
    %318 = arith.cmpi ne, %317, %c0_i32_104 : i32
    %319 = arith.extui %318 : i1 to i32
    %320 = arith.sitofp %319 : i32 to f32
    %321 = arith.index_cast %317 : i32 to index
    %c0_105 = arith.constant 0 : index
    %322 = vector.load %arg3[%321, %c0_105] : memref<64x128xf32, #tpu.memory_space<vmem>>, vector<1x128xf32>
    %323 = vector.broadcast %320 : f32 to vector<1x128xf32>
    %324 = arith.mulf %322, %323 : vector<1x128xf32>
    %325 = arith.addf %313, %324 : vector<1x128xf32>
    %c24_i32_106 = arith.constant 24 : i32
    %326 = arith.addi %0, %c24_i32_106 : i32
    %c2_i32_107 = arith.constant 2 : i32
    %327 = arith.addi %326, %c2_i32_107 : i32
    %328 = arith.index_cast %327 : i32 to index
    %329 = memref.load %arg2[%328] : memref<64xi32, #tpu.memory_space<smem>>
    %c0_i32_108 = arith.constant 0 : i32
    %330 = arith.cmpi ne, %329, %c0_i32_108 : i32
    %331 = arith.extui %330 : i1 to i32
    %332 = arith.sitofp %331 : i32 to f32
    %333 = arith.index_cast %329 : i32 to index
    %c0_109 = arith.constant 0 : index
    %334 = vector.load %arg3[%333, %c0_109] : memref<64x128xf32, #tpu.memory_space<vmem>>, vector<1x128xf32>
    %335 = vector.broadcast %332 : f32 to vector<1x128xf32>
    %336 = arith.mulf %334, %335 : vector<1x128xf32>
    %337 = arith.addf %325, %336 : vector<1x128xf32>
    %c24_i32_110 = arith.constant 24 : i32
    %338 = arith.addi %0, %c24_i32_110 : i32
    %c3_i32_111 = arith.constant 3 : i32
    %339 = arith.addi %338, %c3_i32_111 : i32
    %340 = arith.index_cast %339 : i32 to index
    %341 = memref.load %arg2[%340] : memref<64xi32, #tpu.memory_space<smem>>
    %c0_i32_112 = arith.constant 0 : i32
    %342 = arith.cmpi ne, %341, %c0_i32_112 : i32
    %343 = arith.extui %342 : i1 to i32
    %344 = arith.sitofp %343 : i32 to f32
    %345 = arith.index_cast %341 : i32 to index
    %c0_113 = arith.constant 0 : index
    %346 = vector.load %arg3[%345, %c0_113] : memref<64x128xf32, #tpu.memory_space<vmem>>, vector<1x128xf32>
    %347 = vector.broadcast %344 : f32 to vector<1x128xf32>
    %348 = arith.mulf %346, %347 : vector<1x128xf32>
    %349 = arith.addf %337, %348 : vector<1x128xf32>
    %c6 = arith.constant 6 : index
    %c0_114 = arith.constant 0 : index
    %350 = vector.load %arg4[%c6, %c0_114] : memref<8x128xf32, #tpu.memory_space<vmem>>, vector<1x128xf32>
    tpu.vector_store %arg4[%c6, %c0_114], %349 {strides = array<i32>} : memref<8x128xf32, #tpu.memory_space<vmem>>, vector<1x128xf32>,
    %cst_115 = arith.constant 0.000000e+00 : f32
    %351 = vector.broadcast %cst_115 : f32 to vector<1x128xf32>
    %c28_i32 = arith.constant 28 : i32
    %352 = arith.addi %0, %c28_i32 : i32
    %c0_i32_116 = arith.constant 0 : i32
    %353 = arith.addi %352, %c0_i32_116 : i32
    %354 = arith.index_cast %353 : i32 to index
    %355 = memref.load %arg2[%354] : memref<64xi32, #tpu.memory_space<smem>>
    %c0_i32_117 = arith.constant 0 : i32
    %356 = arith.cmpi ne, %355, %c0_i32_117 : i32
    %357 = arith.extui %356 : i1 to i32
    %358 = arith.sitofp %357 : i32 to f32
    %359 = arith.index_cast %355 : i32 to index
    %c0_118 = arith.constant 0 : index
    %360 = vector.load %arg3[%359, %c0_118] : memref<64x128xf32, #tpu.memory_space<vmem>>, vector<1x128xf32>
    %361 = vector.broadcast %358 : f32 to vector<1x128xf32>
    %362 = arith.mulf %360, %361 : vector<1x128xf32>
    %363 = arith.addf %351, %362 : vector<1x128xf32>
    %c28_i32_119 = arith.constant 28 : i32
    %364 = arith.addi %0, %c28_i32_119 : i32
    %c1_i32_120 = arith.constant 1 : i32
    %365 = arith.addi %364, %c1_i32_120 : i32
    %366 = arith.index_cast %365 : i32 to index
    %367 = memref.load %arg2[%366] : memref<64xi32, #tpu.memory_space<smem>>
    %c0_i32_121 = arith.constant 0 : i32
    %368 = arith.cmpi ne, %367, %c0_i32_121 : i32
    %369 = arith.extui %368 : i1 to i32
    %370 = arith.sitofp %369 : i32 to f32
    %371 = arith.index_cast %367 : i32 to index
    %c0_122 = arith.constant 0 : index
    %372 = vector.load %arg3[%371, %c0_122] : memref<64x128xf32, #tpu.memory_space<vmem>>, vector<1x128xf32>
    %373 = vector.broadcast %370 : f32 to vector<1x128xf32>
    %374 = arith.mulf %372, %373 : vector<1x128xf32>
    %375 = arith.addf %363, %374 : vector<1x128xf32>
    %c28_i32_123 = arith.constant 28 : i32
    %376 = arith.addi %0, %c28_i32_123 : i32
    %c2_i32_124 = arith.constant 2 : i32
    %377 = arith.addi %376, %c2_i32_124 : i32
    %378 = arith.index_cast %377 : i32 to index
    %379 = memref.load %arg2[%378] : memref<64xi32, #tpu.memory_space<smem>>
    %c0_i32_125 = arith.constant 0 : i32
    %380 = arith.cmpi ne, %379, %c0_i32_125 : i32
    %381 = arith.extui %380 : i1 to i32
    %382 = arith.sitofp %381 : i32 to f32
    %383 = arith.index_cast %379 : i32 to index
    %c0_126 = arith.constant 0 : index
    %384 = vector.load %arg3[%383, %c0_126] : memref<64x128xf32, #tpu.memory_space<vmem>>, vector<1x128xf32>
    %385 = vector.broadcast %382 : f32 to vector<1x128xf32>
    %386 = arith.mulf %384, %385 : vector<1x128xf32>
    %387 = arith.addf %375, %386 : vector<1x128xf32>
    %c28_i32_127 = arith.constant 28 : i32
    %388 = arith.addi %0, %c28_i32_127 : i32
    %c3_i32_128 = arith.constant 3 : i32
    %389 = arith.addi %388, %c3_i32_128 : i32
    %390 = arith.index_cast %389 : i32 to index
    %391 = memref.load %arg2[%390] : memref<64xi32, #tpu.memory_space<smem>>
    %c0_i32_129 = arith.constant 0 : i32
    %392 = arith.cmpi ne, %391, %c0_i32_129 : i32
    %393 = arith.extui %392 : i1 to i32
    %394 = arith.sitofp %393 : i32 to f32
    %395 = arith.index_cast %391 : i32 to index
    %c0_130 = arith.constant 0 : index
    %396 = vector.load %arg3[%395, %c0_130] : memref<64x128xf32, #tpu.memory_space<vmem>>, vector<1x128xf32>
    %397 = vector.broadcast %394 : f32 to vector<1x128xf32>
    %398 = arith.mulf %396, %397 : vector<1x128xf32>
    %399 = arith.addf %387, %398 : vector<1x128xf32>
    %c7 = arith.constant 7 : index
    %c0_131 = arith.constant 0 : index
    %400 = vector.load %arg4[%c7, %c0_131] : memref<8x128xf32, #tpu.memory_space<vmem>>, vector<1x128xf32>
    tpu.vector_store %arg4[%c7, %c0_131], %399 {strides = array<i32>} : memref<8x128xf32, #tpu.memory_space<vmem>>, vector<1x128xf32>,
    return
  }
  func.func @transform_0(%arg0: i32, %arg1: memref<1xi32, #tpu.memory_space<smem>>, %arg2: memref<64xi32, #tpu.memory_space<smem>>) -> (i32, i32) {
    %c0_i32 = arith.constant 0 : i32
    %c0_i32_0 = arith.constant 0 : i32
    %c0_i32_1 = arith.constant 0 : i32
    return %c0_i32, %c0_i32_0 : i32, i32
  }
  func.func @transform_1(%arg0: i32, %arg1: memref<1xi32, #tpu.memory_space<smem>>, %arg2: memref<64xi32, #tpu.memory_space<smem>>) -> (i32, i32) {
    %c0_i32 = arith.constant 0 : i32
    %c0_i32_0 = arith.constant 0 : i32
    return %arg0, %c0_i32 : i32, i32
  }
}

</mosaic_0001>

<bundles_post_ra>
// kernel: tpu_custom_call.1
= control target key start
LH: loop header
LB: loop body
LE: loop exit
PB: predicated region body
PF: predicated region fallthrough
CT: control target
= control target key end

     0   :  { %s1017_s0 = inlined_call_operand.<no memory space> [shape: s32[1], index: 0, kind: input, shape index: {}]   ;;  %s1018_s1 = inlined_call_operand.vmem [shape: s32[64], index: 1, kind: input, shape index: {}]   ;;  %s1019_s2 = inlined_call_operand.hbm [shape: f32[64,128], index: 2, kind: input, shape index: {}]   ;;  %s1020_s3 = inlined_call_operand.hbm [shape: f32[16,128], index: 3, kind: output, shape index: {}]  }
   0x1   :  { %s9_s14 = sshll.u32 %s1018_s1, 4  ;;  %s10_s14 = int_to_ptr.vmem [resolvable:$true] %s9_s14 }
   0x2   :  { %s616_s15 = scalar_lea.vmem %s10_s14, 16  ;;  %p621_p1 = scmp.lt.s32.totalorder %s10_s14, %s10_s14 }
   0x3   :  { %p617_p0 = scmp.ne.s32.totalorder %s10_s14, %s616_s15  ;;  %p622_p2 = scmp.lt.s32.totalorder %s616_s15, %s616_s15 }
   0x5   :  { %p623_p3 = por %p622_p2, %p621_p1 }
   0x7   :  { %p624_p4 = pnand %p623_p3, %p617_p0 }
   0x9   :  { %627 = shalt.err (!%p624_p4)  }
   0xa   :  { %s726_s0 = smov [#allocation4]  }
   0xb   :  { %12 = dma.vmem_to_smem %s10_s14, 16, %s726_s0, [#allocation2] }
   0xc   :  { %700 = dma.done.wait [#allocation2], 16 }
   0xd   :  { %701 = vsyncadd [#allocation2], 4294967280 }
   0xe   :  { %14 = sfence }
   0xf   :  { %15 = vsyncpa [#allocation6], 0 }
  0x10   :  { %16 = vsyncpa [#allocation7], 0 }
  0x11   :  { %18 = vsyncpa [#allocation7 + $0x1], 0  ;;  %s754_s16 = smov 0   ;;  %s756_s17 = smov 0  }
  0x12   :  { %s758_s1 = smov 0   ;;  %s760_s18 = smov 0  }
  0x13 LB: > { %s775_s19 = sadd.s32 4294967295, %s724_s18   ;;  %s552_s20 = sadd.s32 4294967294, %s724_s18   ;;  %s724_s18 = sphi %s760_s18, %s1036_s18   ;;  %s720_s1 = sphi %s758_s1, %s1035_s1   ;;  %s716_s17 = sphi %s756_s17, %s1034_s17   ;;  %s712_s16 = sphi %s754_s16, %s1033_s16  }
  0x14   : > { %s779_s21 = sadd.s32 1, %s724_s18   ;;  %s52_s22 = sadd.s32 1, %s720_s1 }
  0x15   : > { %s49_s23 = ssub.s32 %s724_s18, %s779_s21  ;;  %p62_p5 = scmp.ne.s32.totalorder %s720_s1, %s716_s17 }
  0x16   : > { %p50_p6 = scmp.eq.s32.totalorder %s49_s23, 0  ;;  %p63_p7 = scmp.eq.s32.totalorder %s775_s19, 1 }
  0x17   : > { %p68_p8 = scmp.ne.s32.totalorder %s716_s17, %s712_s16  ;;  %p69_p9 = scmp.eq.s32.totalorder %s552_s20, 1 }
  0x18   : > { %s790_s24 = scalar_select %p50_p6, %s720_s1, %s52_s22  }
  0x19   : > { %p792_p10 = por %p63_p7, %p62_p5  ;;  %p796_p11 = por %p69_p9, %p68_p8 }
  0x1a   : > { %p553_p12 = scmp.ge.s32.totalorder %s724_s18, 1  ;;  %p76_p13 = scmp.lt.s32.totalorder %s724_s18, 3 }
  0x1b   : > { %s1024_s25 = scalar_select %p792_p10, 1, 0 }
  0x1c   : > { %s1025_s26 = scalar_select %p796_p11, 1, 0 }
  0x1d   : > { %p1021_p0 = scmp.eq.s32.totalorder %s775_s19, 0  ;;  %p803_p1 = pnand %p553_p12, %p76_p13 }
  0x1e   : > { %s727_s28 = smov [#allocation5]   ;;  %s628_s6 = scalar_lea.hbm %s1019_s2, 1024 }
  0x1f   : > { %s1026_s27 = scalar_select %p803_p1, 1, 0 }
  0x20   : > { %s88_s29 = sshll.u32 %s727_s28, 4  ;;  %p569_p2 = pneg %p803_p1  ;;  %s89_s29 = int_to_ptr.vmem [resolvable:$true] %s88_s29 }
  0x21   : > { %p629_p4 = scmp.ne.s32.totalorder %s1019_s2, %s628_s6  ;;  %p635_p8 = scmp.lt.u32.totalorder %s628_s6, %s1019_s2 }
  0x22   : > { %p811_p3 = pnand %p1021_p0, %p569_p2 }
  0x24   : > { %p630_p5 = pneg %p811_p3 }
  0x26   : > { %p631_p6 = pnand %p630_p5, %p629_p4 }
  0x28   : > { %p632_p7 = pneg %p631_p6 }
  0x2a   : > { %p637_p9 = pnand %p635_p8, %p632_p7 }
  0x2c   : > { %640 = shalt.err (!%p637_p9)
}
  0x2d   : > { %s641_s11 = scalar_lea.vmem %s89_s29, 1024  ;;  %p649_p0 = scmp.lt.s32.totalorder %s89_s29, %s89_s29 }
  0x2e   : > { %p642_p12 = scmp.ne.s32.totalorder %s89_s29, %s641_s11  ;;  %p650_p11 = scmp.lt.s32.totalorder %s641_s11, %s641_s11 }
  0x30   : > { %p644_p13 = pnand %p642_p12, %p630_p5  ;;  %p651_p10 = por %p650_p11, %p649_p0 }
  0x32   : > { %p645_p2 = pneg %p644_p13 }
  0x34   : > { %p652_p1 = pnand %p651_p10, %p645_p2 }
  0x36   : > { %655 = shalt.err (!%p652_p1)
}
  0x37   : > { %s728_s12 = smov 128   ;;  %s729_s13 = smov 8  }
  0x38   : > { %572 = dma.hbm_to_vmem [thread:$0]  (!%p811_p3), %s1019_s2, 1024, %s89_s29, [#allocation6], %s728_s12, %s728_s12, %s729_s13  }
  0x39   : > { %p1028_p4 = scmp.ne.s32.totalorder %s1026_s27, 0 }
  0x3a   : > { %p1029_p6 = scmp.eq.s32.totalorder (!%p1028_p4), %s775_s19, 0 }
  0x3b   : > { %104 = sbr.rel (%p1028_p4) target bundleno = 207 (0xcf), region = 24 }
  0x42   : > { %703 = dma.done.wait (%p1029_p6), [#allocation6], 1024   ;;  %p1030_p5 = pmov %p1029_p6 }
  0x43   : > { %s116_s0 = sand.u32 1, %s716_s17   ;;  %s839_s20 = sshll.u32 %s775_s19, 5 }
  0x44   : > { %705 = vsyncadd (%p1030_p5), [#allocation6], 4294966272  ;;  %s120_s22 = sld [smem:[#allocation4 + %s839_s20]]  ;;  %s844_s23 = sshll.u32 %s116_s0, 3 }
  0x45   : > { %s129_s27 = sadd.s32 1, %s839_s20  ;;  %s139_s29 = sadd.s32 2, %s839_s20 }
  0x46   : > { %s130_s28 = sld [smem:[#allocation4 + %s129_s27]]  ;;  %s149_s4 = sadd.s32 3, %s839_s20 }
  0x47   : > { %s140_s30 = sld [smem:[#allocation4 + %s139_s29]]  ;;  %s160_s6 = sadd.s32 4, %s839_s20 }
  0x48   : > { %s849_s5 = sld [smem:[#allocation4 + %s149_s4]]  ;;  %s170_s7 = sadd.s32 5, %s839_s20 }
  0x49   : > { %s853_s8 = sld [smem:[#allocation4 + %s160_s6]] }
  0x4a   : > { %p121_p10 = scmp.ne.s32.totalorder %s120_s22, 0  ;;  %s855_s9 = sld [smem:[#allocation4 + %s170_s7]] }
  0x4b   : > { %s124_s12 = scalar_lea.vmem [#allocation5], %s120_s22 }
  0x4c   : > { %s122_s10 = scalar_select %p121_p10, 1, 0  ;;  %v125_v0 = vld [vmem:[%s124_s12] sm:$0x1] }
  0x4d   : > { %p131_p11 = scmp.ne.s32.totalorder %s130_s28, 0  ;;  %p141_p0 = scmp.ne.s32.totalorder %s140_s30, 0 }
  0x4e   : > { %s123_s11 = scvt.s32.f32 %s122_s10  ;;  %s134_s27 = scalar_lea.vmem [#allocation5], %s130_s28 }
  0x4f   : > { %s132_s13 = scalar_select %p131_p11, 1, 0  ;;  %v135_v2 = vld [vmem:[%s134_s27] sm:$0x1] }
  0x50   : > { %v126_v1 = vstv %s123_s11  ;;  %s142_s14 = scalar_select %p141_p0, 1, 0 }
  0x51   : > { %s133_s15 = scvt.s32.f32 %s132_s13  ;;  %v127_v3 = vmul.f32 %v126_v1, %v125_v0  ;;  %s144_s4 = scalar_lea.vmem [#allocation5], %s140_s30 }
  0x52   : > { %s143_s29 = scvt.s32.f32 %s142_s14  ;;  %v145_v4 = vld [vmem:[%s144_s4] sm:$0x1]  ;;  %p151_p1 = scmp.ne.s32.totalorder %s849_s5, 0 }
  0x53   : > { %v136_v5 = vstv %s133_s15  ;;  %p162_p3 = scmp.ne.s32.totalorder %s853_s8, 0  ;;  %s154_s7 = scalar_lea.vmem [#allocation5], %s849_s5 }
  0x54   : > { %v137_v6 = vmul.f32 %v136_v5, %v135_v2  ;;  %v146_v7 = vstv %s143_s29  ;;  %s152_s22 = scalar_select %p151_p1, 1, 0  ;;  %v155_v10 = vld [vmem:[%s154_s7] sm:$0x1] }
  0x55   : > { %v147_v8 = vmul.f32 %v146_v7, %v145_v4  ;;  %s163_s6 = scalar_select %p162_p3, 1, 0 }
  0x56   : > { %v138_v9 = vadd.f32 %v137_v6, %v127_v3  ;;  %s153_s28 = scvt.s32.f32 %s152_s22  ;;  %p172_p7 = scmp.ne.s32.totalorder %s855_s9, 0 }
  0x57   : > { %s164_s10 = scvt.s32.f32 %s163_s6  ;;  %s180_s30 = sadd.s32 6, %s839_s20 }
  0x58   : > { %v148_v11 = vadd.f32 %v147_v8, %v138_v9  ;;  %v156_v12 = vstv %s153_s28  ;;  %s173_s11 = scalar_select %p172_p7, 1, 0 }
  0x59   : > { %v157_v13 = vmul.f32 %v156_v12, %v155_v10  ;;  %s862_s12 = sld [smem:[#allocation4 + %s180_s30]]  ;;  %s190_s13 = sadd.s32 7, %s839_s20  ;;  %v167_v16 = vstv %s164_s10 }
  0x5a   : > { %s174_s14 = scvt.s32.f32 %s173_s11  ;;  %s865_s15 = sld [smem:[#allocation4 + %s190_s13]] }
  0x5b   : > { %v158_v14 = vadd.f32 %v157_v13, %v148_v11  ;;  %s201_s5 = sadd.s32 8, %s839_s20  ;;  %s211_s27 = sadd.s32 9, %s839_s20 }
  0x5c   : > { %s870_s29 = scalar_lea.vmem [#allocation8], %s844_s23  ;;  %s873_s4 = sld [smem:[#allocation4 + %s201_s5]]  ;;  %v177_v18 = vstv %s174_s14 }
  0x5d   : > { %159 = vst [vmem:[%s870_s29] sm:$0x1] %v158_v14  ;;  %s875_s22 = sld [smem:[#allocation4 + %s211_s27]]  ;;  %s165_s6 = scalar_lea.vmem [#allocation5], %s853_s8 }
  0x5e   : > { %v166_v15 = vld [vmem:[%s165_s6] sm:$0x1]  ;;  %s175_s28 = scalar_lea.vmem [#allocation5], %s855_s9  ;;  %s221_s7 = sadd.s32 10, %s839_s20 }
  0x5f   : > { %v176_v17 = vld [vmem:[%s175_s28] sm:$0x1]  ;;  %s231_s30 = sadd.s32 11, %s839_s20  ;;  %s881_s23 = sld [smem:[#allocation4 + %s221_s7]]  ;;  %v168_v19 = vmul.f32 %v167_v16, %v166_v15 }
  0x60   : > { %s883_s11 = sld [smem:[#allocation4 + %s231_s30]]  ;;  %p182_p8 = scmp.ne.s32.totalorder %s862_s12, 0  ;;  %v178_v20 = vmul.f32 %v177_v18, %v176_v17 }
  0x61   : > { %p192_p9 = scmp.ne.s32.totalorder %s865_s15, 0  ;;  %s185_s9 = scalar_lea.vmem [#allocation5], %s862_s12 }
  0x62   : > { %s183_s8 = scalar_select %p182_p8, 1, 0  ;;  %v186_v21 = vld [vmem:[%s185_s9] sm:$0x1]  ;;  %v179_v22 = vadd.f32 %v178_v20, %v168_v19 }
  0x63   : > { %s193_s13 = scalar_select %p192_p9, 1, 0 }
  0x64   : > { %s184_s10 = scvt.s32.f32 %s183_s8  ;;  %p203_p12 = scmp.ne.s32.totalorder %s873_s4, 0 }
  0x65   : > { %s194_s14 = scvt.s32.f32 %s193_s13  ;;  %s195_s5 = scalar_lea.vmem [#allocation5], %s865_s15 }
  0x66   : > { %v196_v23 = vld [vmem:[%s195_s5] sm:$0x1]  ;;  %v187_v24 = vstv %s184_s10  ;;  %s204_s27 = scalar_select %p203_p12, 1, 0 }
  0x67   : > { %v188_v25 = vmul.f32 %v187_v24, %v186_v21  ;;  %v197_v26 = vstv %s194_s14  ;;  %p213_p13 = scmp.ne.s32.totalorder %s875_s22, 0  ;;  %p223_p2 = scmp.ne.s32.totalorder %s881_s23, 0 }
  0x68   : > { %v198_v27 = vmul.f32 %v197_v26, %v196_v23  ;;  %s205_s6 = scvt.s32.f32 %s204_s27  ;;  %s206_s12 = scalar_lea.vmem [#allocation5], %s873_s4 }
  0x69   : > { %v189_v28 = vadd.f32 %v188_v25, %v179_v22  ;;  %v207_v29 = vld [vmem:[%s206_s12] sm:$0x1]  ;;  %s214_s28 = scalar_select %p213_p13, 1, 0 }
  0x6a   : > { %v208_v30 = vstv %s205_s6  ;;  %s224_s15 = scalar_select %p223_p2, 1, 0 }
  0x6b   : > { %v199_v31 = vadd.f32 %v198_v27, %v189_v28  ;;  %s215_s7 = scvt.s32.f32 %s214_s28  ;;  %s216_s30 = scalar_lea.vmem [#allocation5], %s875_s22  ;;  %v209_v33 = vmul.f32 %v208_v30, %v207_v29 }
  0x6c   : > { %v217_v32 = vld [vmem:[%s216_s30] sm:$0x1]  ;;  %s225_s8 = scvt.s32.f32 %s224_s15  ;;  %s226_s13 = scalar_lea.vmem [#allocation5], %s881_s23 }
  0x6d   : > { %v227_v34 = vld [vmem:[%s226_s13] sm:$0x1]  ;;  %p233_p4 = scmp.ne.s32.totalorder %s883_s11, 0  ;;  %200 = vst [vmem:[%s870_s29 + $0x1] sm:$0x1] %v199_v31  ;;  %v218_v35 = vstv %s215_s7  ;;  %s242_s4 = sadd.s32 12, %s839_s20 }
  0x6e   : > { %v219_v36 = vmul.f32 %v218_v35, %v217_v32  ;;  %v228_v37 = vstv %s225_s8  ;;  %s243_s9 = sld [smem:[#allocation4 + %s242_s4]]  ;;  %s252_s22 = sadd.s32 13, %s839_s20 }
  0x6f   : > { %s234_s10 = scalar_select %p233_p4, 1, 0  ;;  %v229_v38 = vmul.f32 %v228_v37, %v227_v34 }
  0x70   : > { %v220_v39 = vadd.f32 %v219_v36, %v209_v33  ;;  %s236_s5 = scalar_lea.vmem [#allocation5], %s883_s11  ;;  %s253_s23 = sld [smem:[#allocation4 + %s252_s22]] }
  0x71   : > { %s235_s14 = scvt.s32.f32 %s234_s10  ;;  %v237_v40 = vld [vmem:[%s236_s5] sm:$0x1]  ;;  %s262_s27 = sadd.s32 14, %s839_s20 }
  0x72   : > { %s272_s6 = sadd.s32 15, %s839_s20  ;;  %v230_v41 = vadd.f32 %v229_v38, %v220_v39  ;;  %s263_s12 = sld [smem:[#allocation4 + %s262_s27]] }
  0x73   : > { %v238_v42 = vstv %s235_s14  ;;  %s902_s28 = sld [smem:[#allocation4 + %s272_s6]]  ;;  %s283_s15 = sadd.s32 16, %s839_s20 }
  0x74   : > { %v239_v43 = vmul.f32 %v238_v42, %v237_v40  ;;  %s293_s7 = sadd.s32 17, %s839_s20  ;;  %s906_s30 = sld [smem:[#allocation4 + %s283_s15]] }
  0x75   : > { %s908_s8 = sld [smem:[#allocation4 + %s293_s7]]  ;;  %p244_p6 = scmp.ne.s32.totalorder %s243_s9, 0 }
  0x76   : > { %v240_v44 = vadd.f32 %v239_v43, %v230_v41  ;;  %p254_p5 = scmp.ne.s32.totalorder %s253_s23, 0  ;;  %s247_s10 = scalar_lea.vmem [#allocation5], %s243_s9 }
  0x77   : > { %s245_s11 = scalar_select %p244_p6, 1, 0  ;;  %v248_v45 = vld [vmem:[%s247_s10] sm:$0x1] }
  0x78   : > { %241 = vst [vmem:[%s870_s29 + $0x2] sm:$0x1] %v240_v44  ;;  %s255_s13 = scalar_select %p254_p5, 1, 0 }
  0x79   : > { %s246_s4 = scvt.s32.f32 %s245_s11  ;;  %p264_p10 = scmp.ne.s32.totalorder %s263_s12, 0 }
  0x7a   : > { %s256_s22 = scvt.s32.f32 %s255_s13  ;;  %s257_s14 = scalar_lea.vmem [#allocation5], %s253_s23 }
  0x7b   : > { %v258_v46 = vld [vmem:[%s257_s14] sm:$0x1]  ;;  %v249_v47 = vstv %s246_s4  ;;  %s265_s5 = scalar_select %p264_p10, 1, 0 }
  0x7c   : > { %v250_v48 = vmul.f32 %v249_v47, %v248_v45  ;;  %v259_v49 = vstv %s256_s22  ;;  %p274_p11 = scmp.ne.s32.totalorder %s902_s28, 0  ;;  %s267_s6 = scalar_lea.vmem [#allocation5], %s263_s12 }
  0x7d   : > { %v260_v50 = vmul.f32 %v259_v49, %v258_v46  ;;  %s266_s27 = scvt.s32.f32 %s265_s5  ;;  %v268_v51 = vld [vmem:[%s267_s6] sm:$0x1]  ;;  %p285_p0 = scmp.ne.s32.totalorder %s906_s30, 0 }
  0x7e   : > { %s275_s15 = scalar_select %p274_p11, 1, 0 }
  0x7f   : > { %v261_v52 = vadd.f32 %v260_v50, %v250_v48  ;;  %v269_v53 = vstv %s266_s27  ;;  %s286_s9 = scalar_select %p285_p0, 1, 0 }
  0x80   : > { %v270_v54 = vmul.f32 %v269_v53, %v268_v51  ;;  %s276_s23 = scvt.s32.f32 %s275_s15  ;;  %s277_s7 = scalar_lea.vmem [#allocation5], %s902_s28 }
  0x81   : > { %v278_v55 = vld [vmem:[%s277_s7] sm:$0x1]  ;;  %s287_s11 = scvt.s32.f32 %s286_s9  ;;  %p295_p1 = scmp.ne.s32.totalorder %s908_s8, 0 }
  0x82   : > { %v271_v56 = vadd.f32 %v270_v54, %v261_v52  ;;  %v279_v57 = vstv %s276_s23  ;;  %s303_s12 = sadd.s32 18, %s839_s20  ;;  %s313_s10 = sadd.s32 19, %s839_s20 }
  0x83   : > { %v280_v58 = vmul.f32 %v279_v57, %v278_v55  ;;  %s296_s13 = scalar_select %p295_p1, 1, 0  ;;  %v290_v61 = vstv %s287_s11 }
  0x84   : > { %s304_s4 = sld [smem:[#allocation4 + %s303_s12]]  ;;  %s324_s28 = sadd.s32 20, %s839_s20 }
  0x85   : > { %v281_v59 = vadd.f32 %v280_v58, %v271_v56  ;;  %s297_s22 = scvt.s32.f32 %s296_s13  ;;  %s917_s14 = sld [smem:[#allocation4 + %s313_s10]] }
  0x86   : > { %s334_s5 = sadd.s32 21, %s839_s20  ;;  %s922_s27 = sld [smem:[#allocation4 + %s324_s28]] }
  0x87   : > { %282 = vst [vmem:[%s870_s29 + $0x3] sm:$0x1] %v281_v59  ;;  %s924_s6 = sld [smem:[#allocation4 + %s334_s5]]  ;;  %s288_s15 = scalar_lea.vmem [#allocation5], %s906_s30  ;;  %v300_v63 = vstv %s297_s22 }
  0x88   : > { %v289_v60 = vld [vmem:[%s288_s15] sm:$0x1]  ;;  %s298_s9 = scalar_lea.vmem [#allocation5], %s908_s8  ;;  %s344_s23 = sadd.s32 22, %s839_s20 }
  0x89   : > { %v299_v62 = vld [vmem:[%s298_s9] sm:$0x1]  ;;  %s354_s7 = sadd.s32 23, %s839_s20  ;;  %s930_s12 = sld [smem:[#allocation4 + %s344_s23]]  ;;  %v291_v0 = vmul.f32 %v290_v61, %v289_v60 }
  0x8a   : > { %s932_s13 = sld [smem:[#allocation4 + %s354_s7]]  ;;  %p305_p3 = scmp.ne.s32.totalorder %s304_s4, 0  ;;  %v301_v1 = vmul.f32 %v300_v63, %v299_v62 }
  0x8b   : > { %p315_p7 = scmp.ne.s32.totalorder %s917_s14, 0  ;;  %s308_s8 = scalar_lea.vmem [#allocation5], %s304_s4 }
  0x8c   : > { %s306_s10 = scalar_select %p305_p3, 1, 0  ;;  %v309_v2 = vld [vmem:[%s308_s8] sm:$0x1]  ;;  %v302_v3 = vadd.f32 %v301_v1, %v291_v0 }
  0x8d   : > { %s316_s30 = scalar_select %p315_p7, 1, 0 }
  0x8e   : > { %s307_s11 = scvt.s32.f32 %s306_s10  ;;  %p326_p8 = scmp.ne.s32.totalorder %s922_s27, 0 }
  0x8f   : > { %s317_s22 = scvt.s32.f32 %s316_s30  ;;  %s318_s28 = scalar_lea.vmem [#allocation5], %s917_s14 }
  0x90   : > { %v319_v4 = vld [vmem:[%s318_s28] sm:$0x1]  ;;  %v310_v5 = vstv %s307_s11  ;;  %s327_s5 = scalar_select %p326_p8, 1, 0 }
  0x91   : > { %v311_v6 = vmul.f32 %v310_v5, %v309_v2  ;;  %v320_v7 = vstv %s317_s22  ;;  %p336_p9 = scmp.ne.s32.totalorder %s924_s6, 0  ;;  %p346_p12 = scmp.ne.s32.totalorder %s930_s12, 0 }
  0x92   : > { %v321_v8 = vmul.f32 %v320_v7, %v319_v4  ;;  %s328_s15 = scvt.s32.f32 %s327_s5  ;;  %s329_s4 = scalar_lea.vmem [#allocation5], %s922_s27 }
  0x93   : > { %v312_v9 = vadd.f32 %v311_v6, %v302_v3  ;;  %v330_v10 = vld [vmem:[%s329_s4] sm:$0x1]  ;;  %s337_s9 = scalar_select %p336_p9, 1, 0 }
  0x94   : > { %v331_v11 = vstv %s328_s15  ;;  %s347_s14 = scalar_select %p346_p12, 1, 0 }
  0x95   : > { %v322_v12 = vadd.f32 %v321_v8, %v312_v9  ;;  %s338_s23 = scvt.s32.f32 %s337_s9  ;;  %s339_s7 = scalar_lea.vmem [#allocation5], %s924_s6  ;;  %v332_v14 = vmul.f32 %v331_v11, %v330_v10 }
  0x96   : > { %v340_v13 = vld [vmem:[%s339_s7] sm:$0x1]  ;;  %s348_s10 = scvt.s32.f32 %s347_s14  ;;  %s349_s30 = scalar_lea.vmem [#allocation5], %s930_s12 }
  0x97   : > { %v350_v15 = vld [vmem:[%s349_s30] sm:$0x1]  ;;  %p356_p13 = scmp.ne.s32.totalorder %s932_s13, 0  ;;  %323 = vst [vmem:[%s870_s29 + $0x4] sm:$0x1] %v322_v12  ;;  %v341_v16 = vstv %s338_s23  ;;  %s365_s27 = sadd.s32 24, %s839_s20 }
  0x98   : > { %v342_v17 = vmul.f32 %v341_v16, %v340_v13  ;;  %v351_v18 = vstv %s348_s10  ;;  %s366_s8 = sld [smem:[#allocation4 + %s365_s27]]  ;;  %s375_s6 = sadd.s32 25, %s839_s20 }
  0x99   : > { %s357_s11 = scalar_select %p356_p13, 1, 0  ;;  %v352_v19 = vmul.f32 %v351_v18, %v350_v15 }
  0x9a   : > { %v343_v20 = vadd.f32 %v342_v17, %v332_v14  ;;  %s359_s28 = scalar_lea.vmem [#allocation5], %s932_s13  ;;  %s376_s12 = sld [smem:[#allocation4 + %s375_s6]] }
  0x9b   : > { %s358_s22 = scvt.s32.f32 %s357_s11  ;;  %v360_v21 = vld [vmem:[%s359_s28] sm:$0x1]  ;;  %s385_s5 = sadd.s32 26, %s839_s20 }
  0x9c   : > { %s395_s15 = sadd.s32 27, %s839_s20  ;;  %v353_v22 = vadd.f32 %v352_v19, %v343_v20  ;;  %s386_s4 = sld [smem:[#allocation4 + %s385_s5]] }
  0x9d   : > { %v361_v23 = vstv %s358_s22  ;;  %s949_s9 = sld [smem:[#allocation4 + %s395_s15]]  ;;  %s406_s14 = sadd.s32 28, %s839_s20 }
  0x9e   : > { %v362_v24 = vmul.f32 %v361_v23, %v360_v21  ;;  %s416_s23 = sadd.s32 29, %s839_s20  ;;  %s953_s7 = sld [smem:[#allocation4 + %s406_s14]] }
  0x9f   : > { %s955_s10 = sld [smem:[#allocation4 + %s416_s23]]  ;;  %p367_p2 = scmp.ne.s32.totalorder %s366_s8, 0 }
  0xa0   : > { %v363_v25 = vadd.f32 %v362_v24, %v353_v22  ;;  %p377_p4 = scmp.ne.s32.totalorder %s376_s12, 0  ;;  %s370_s11 = scalar_lea.vmem [#allocation5], %s366_s8 }
  0xa1   : > { %s368_s13 = scalar_select %p367_p2, 1, 0  ;;  %v371_v26 = vld [vmem:[%s370_s11] sm:$0x1] }
  0xa2   : > { %364 = vst [vmem:[%s870_s29 + $0x5] sm:$0x1] %v363_v25  ;;  %s378_s30 = scalar_select %p377_p4, 1, 0 }
  0xa3   : > { %s369_s27 = scvt.s32.f32 %s368_s13  ;;  %p387_p6 = scmp.ne.s32.totalorder %s386_s4, 0 }
  0xa4   : > { %s379_s6 = scvt.s32.f32 %s378_s30  ;;  %s380_s22 = scalar_lea.vmem [#allocation5], %s376_s12 }
  0xa5   : > { %v381_v27 = vld [vmem:[%s380_s22] sm:$0x1]  ;;  %v372_v28 = vstv %s369_s27  ;;  %s388_s28 = scalar_select %p387_p6, 1, 0 }
  0xa6   : > { %v373_v29 = vmul.f32 %v372_v28, %v371_v26  ;;  %v382_v30 = vstv %s379_s6  ;;  %p397_p5 = scmp.ne.s32.totalorder %s949_s9, 0  ;;  %s390_s15 = scalar_lea.vmem [#allocation5], %s386_s4 }
  0xa7   : > { %v383_v31 = vmul.f32 %v382_v30, %v381_v27  ;;  %s389_s5 = scvt.s32.f32 %s388_s28  ;;  %v391_v32 = vld [vmem:[%s390_s15] sm:$0x1]  ;;  %p408_p10 = scmp.ne.s32.totalorder %s953_s7, 0 }
  0xa8   : > { %s398_s14 = scalar_select %p397_p5, 1, 0 }
  0xa9   : > { %v384_v33 = vadd.f32 %v383_v31, %v373_v29  ;;  %v392_v34 = vstv %s389_s5  ;;  %s409_s8 = scalar_select %p408_p10, 1, 0 }
  0xaa   : > { %v393_v35 = vmul.f32 %v392_v34, %v391_v32  ;;  %s399_s12 = scvt.s32.f32 %s398_s14  ;;  %s400_s23 = scalar_lea.vmem [#allocation5], %s949_s9 }
  0xab   : > { %v401_v36 = vld [vmem:[%s400_s23] sm:$0x1]  ;;  %s410_s13 = scvt.s32.f32 %s409_s8  ;;  %p418_p11 = scmp.ne.s32.totalorder %s955_s10, 0 }
  0xac   : > { %v394_v37 = vadd.f32 %v393_v35, %v384_v33  ;;  %v402_v38 = vstv %s399_s12  ;;  %s426_s30 = sadd.s32 30, %s839_s20  ;;  %s436_s11 = sadd.s32 31, %s839_s20 }
  0xad   : > { %v403_v39 = vmul.f32 %v402_v38, %v401_v36  ;;  %s419_s4 = scalar_select %p418_p11, 1, 0  ;;  %v413_v42 = vstv %s410_s13 }
  0xae   : > { %s427_s27 = sld [smem:[#allocation4 + %s426_s30]]  ;;  %s411_s28 = scalar_lea.vmem [#allocation5], %s953_s7 }
  0xaf   : > { %v404_v40 = vadd.f32 %v403_v39, %v394_v37  ;;  %s420_s6 = scvt.s32.f32 %s419_s4  ;;  %s437_s22 = sld [smem:[#allocation4 + %s436_s11]]  ;;  %v412_v41 = vld [vmem:[%s411_s28] sm:$0x1] }
  0xb0   : > { %s421_s5 = scalar_lea.vmem [#allocation5], %s955_s10  ;;  %v414_v45 = vmul.f32 %v413_v42, %v412_v41  ;;  %s560_s10 = sshll.u32 %s775_s19, 7 }
  0xb1   : > { %405 = vst [vmem:[%s870_s29 + $0x6] sm:$0x1] %v404_v40  ;;  %v422_v43 = vld [vmem:[%s421_s5] sm:$0x1]  ;;  %v423_v44 = vstv %s420_s6  ;;  %s461_s12 = sshll.u32 %s870_s29, 4  ;;  %s972_s30 = scalar_lea.hbm %s1020_s3, %s560_s10  ;;  %s974_s12 = int_to_ptr.vmem [resolvable:$true] %s461_s12 }
  0xb2   : > { %v424_v46 = vmul.f32 %v423_v44, %v422_v43  ;;  %s448_s4 = scalar_lea.sflag [#allocation7], %s116_s0  ;;  %p1031_p7 = scmp.ne.s32.totalorder %s1024_s25, 0 }
  0xb3   : > { %s730_s19 = smov [#allocation8]  }
  0xb4   : > { %p428_p0 = scmp.ne.s32.totalorder %s427_s27, 0  ;;  %s431_s20 = scalar_lea.vmem [#allocation5], %s427_s27  ;;  %v425_v48 = vadd.f32 %v424_v46, %v414_v45 }
  0xb5   : > { %p438_p1 = scmp.ne.s32.totalorder %s437_s22, 0  ;;  %v432_v47 = vld [vmem:[%s431_s20] sm:$0x1]  ;;  %s441_s8 = scalar_lea.vmem [#allocation5], %s437_s22 }
  0xb6   : > { %s429_s9 = scalar_select %p428_p0, 1, 0  ;;  %v442_v49 = vld [vmem:[%s441_s8] sm:$0x1] }
  0xb7   : > { %s439_s15 = scalar_select %p438_p1, 1, 0 }
  0xb8   : > { %s430_s14 = scvt.s32.f32 %s429_s9  ;;  %s656_s27 = scalar_lea.vmem %s974_s12, 128 }
  0xb9   : > { %s440_s7 = scvt.s32.f32 %s439_s15  ;;  %p657_p3 = scmp.ne.s32.totalorder %s974_s12, %s656_s27 }
  0xba   : > { %v433_v50 = vstv %s430_s14  ;;  %s660_s11 = sshll.u32 %s730_s19, 4  ;;  %s661_s11 = int_to_ptr.vmem [resolvable:$false] %s660_s11 }
  0xbb   : > { %v434_v51 = vmul.f32 %v433_v50, %v432_v47  ;;  %v443_v52 = vstv %s440_s7  ;;  %p658_p8 = pnand %p657_p3, %p1031_p7  ;;  %s662_s6 = scalar_lea.vmem %s661_s11, 256 }
  0xbc   : > { %v444_v53 = vmul.f32 %v443_v52, %v442_v49  ;;  %p663_p12 = scmp.lt.s32.totalorder %s974_s12, %s661_s11  ;;  %p664_p13 = scmp.lt.s32.totalorder %s662_s6, %s656_s27 }
  0xbd   : > { %v435_v54 = vadd.f32 %v434_v51, %v425_v48  ;;  %p659_p9 = pneg %p658_p8 }
  0xbe   : > { %p665_p2 = por %p664_p13, %p663_p12 }
  0xbf   : > { %v445_v55 = vadd.f32 %v444_v53, %v435_v54 }
  0xc0   : > { %p666_p4 = pnand %p665_p2, %p659_p9 }
  0xc1   : > { %446 = vst [vmem:[%s870_s29 + $0x7] sm:$0x1] %v445_v55 }
  0xc2   : > { %669 = shalt.err (!%p666_p4)
}
  0xc3   : > { %s670_s0 = scalar_lea.hbm %s972_s30, 128  ;;  %s674_s28 = scalar_lea.hbm %s1020_s3, 256 }
  0xc4   : > { %p671_p6 = scmp.ne.s32.totalorder %s972_s30, %s670_s0  ;;  %p675_p11 = scmp.lt.u32.totalorder %s972_s30, %s1020_s3 }
  0xc5   : > { %p676_p0 = scmp.lt.u32.totalorder %s674_s28, %s670_s0  ;;  %p678_p3 = scmp.lt.u32.totalorder %s670_s0, %s972_s30 }
  0xc6   : > { %p672_p5 = pnand %p671_p6, %p1031_p7 }
  0xc7   : > { %p677_p1 = por %p676_p0, %p675_p11 }
  0xc8   : > { %p673_p10 = pneg %p672_p5 }
  0xc9   : > { %p679_p8 = por %p678_p3, %p677_p1 }
  0xcb   : > { %p680_p9 = pnand %p679_p8, %p673_p10 }
  0xcd   : > { %683 = shalt.err (!%p680_p9)
}
  0xce   : > { %567 = dma.vmem_to_hbm [thread:$0]  (%p1031_p7), %s974_s12, 128, %s972_s30, %s448_s4  }
  0xcf PF: > { %p579_p12 = scmp.ge.s32.totalorder %s724_s18, 2  ;;  %s473_s15 = sand.u32 1, %s712_s16  }
  0xd0   : > { %p1032_p13 = scmp.ne.s32.totalorder %s1025_s26, 0  ;;  %s474_s14 = scalar_lea.sflag [#allocation7], %s473_s15 }
  0xd2   : > { %p574_p2 = pnand %p579_p12, %p1032_p13 }
  0xd4   : > { %707 = dma.done.wait (!%p574_p2), %s474_s14, 128  }
  0xd5   : > { %709 = vsyncadd (!%p574_p2), %s474_s14, 4294967168  ;;  %p21_p4 = scmp.ge.s32.totalorder %s779_s21, 4   ;;  %s1033_s16 = smov %s716_s17 }
  0xd6   : > { %s1034_s17 = smov %s720_s1  ;;  %s1035_s1 = smov %s790_s24 }
  0xd7   : > { %s1036_s18 = smov %s779_s21  ;;  %23 = sbr.rel (!%p21_p4) target bundleno = 19 (0x13), region = 93 }
  0xde   :  { %479 = vsyncpa [#allocation6], 1 }
  0xdf   :  { %481 = vsyncpa [#allocation6 + $0x1], 1 }
  0xe0   :  { %482 = vsyncpa [#allocation7], 1 }
  0xe1   :  { %484 = vsyncpa [#allocation7 + $0x1], 1 }

</bundles_post_ra>
